<compile_context>
chip_gen: v5e
topology: v5e:2x2
jax: 0.10.0
libtpu: 0.0.40
codegen_flags: <defaults>
</compile_context>

<pallas_src>
import functools
from itertools import combinations

import jax
import jax.numpy as jnp
from jax.experimental import pallas as pl
from jax.experimental.pallas import tpu as pltpu


# Gate for the single block-diagonal matmul: keep the contraction depth within
# one MXU pass (256-deep on v6e/v7x; still fine on v5e's 128-deep MXU).
_BLOCK_DIAG_MAX_FD = 256


def _bilinear_blockdiag_kernel(x_ref, w_ref, out_ref, *, num_fields, dim, mxu_dtype):
    """One batch tile, F*D <= 256.

    x_ref  : (B_tile, F*D)   fields concatenated along the lane dim
    w_ref  : (F*D, P*D)      block-diagonal packed weights (resident in VMEM)
    out_ref: (B_tile, P*D)   pair outputs concatenated along the lane dim
    """
    F, D = num_fields, dim
    x = x_ref[...]
    w = w_ref[...]

    # ONE MXU matmul: column block p of w holds W_p^T at row block i_p (zeros
    # elsewhere), so y[:, p*D:(p+1)*D] == x_{i_p} @ W_p^T.  f32 accumulation.
    y = jnp.dot(x.astype(mxu_dtype), w, preferred_element_type=jnp.float32)

    # Right operands x_{j_p}: combinations order groups pairs by left field i,
    # whose j's are contiguous -> F-1 static slices, one input-side concat.
    xf32 = x.astype(jnp.float32)
    xj = jnp.concatenate(
        [xf32[:, (i + 1) * D:F * D] for i in range(F - 1)], axis=-1)

    # Single unmasked full-block store (no result concatenate / re-copy).
    out_ref[...] = (y * xj).astype(out_ref.dtype)


def _bilinear_grouped_kernel(x_ref, wt_ref, out_ref, *, num_fields, dim, mxu_dtype):
    """Fallback for F*D > 256: one matmul per left field, direct sub-slice stores."""
    F, D = num_fields, dim
    x = x_ref[...]
    wt = wt_ref[...]                      # (D, P*D): column block p is W_p^T
    x_mxu = x.astype(mxu_dtype)
    xf32 = x.astype(jnp.float32)

    off = 0
    for i in range(F - 1):
        cnt = F - 1 - i                   # pairs (i, i+1) .. (i, F-1)
        xi = x_mxu[:, i * D:(i + 1) * D]
        wg = wt[:, off * D:(off + cnt) * D]
        y = jnp.dot(xi, wg, preferred_element_type=jnp.float32)
        xj = xf32[:, (i + 1) * D:F * D]
        # Static sub-slice store (no full-width result concatenate temp).
        out_ref[:, off * D:(off + cnt) * D] = (y * xj).astype(out_ref.dtype)
        off += cnt


def pack_bilinear_weights(weights, num_fields, mxu_dtype=None):
    """One-time parameter prep (outside the hot path).

    weights: (P, D, D); weights[p] is the nn.Linear weight W_p (out x in) for
             pair p in itertools.combinations(range(num_fields), 2) order.
    mxu_dtype: optional MXU operand dtype (e.g. jnp.bfloat16 on v6e/v7x);
             defaults to weights.dtype.  Accumulation is always f32.

    Returns either
      * (F*D, P*D) block-diagonal matrix (W_p^T at row block i_p, col block p)
        when F*D <= 256 (single-matmul kernel), or
      * (D, P*D) with column block p equal to W_p^T (grouped fallback).
    """
    num_pairs, dim, _ = weights.shape
    pairs = list(combinations(range(num_fields), 2))
    assert len(pairs) == num_pairs
    dt = jnp.dtype(mxu_dtype) if mxu_dtype is not None else weights.dtype
    w = weights.astype(dt)

    if num_fields * dim <= _BLOCK_DIAG_MAX_FD:
        wbd = jnp.zeros((num_fields * dim, num_pairs * dim), dtype=dt)
        for p, (i, _j) in enumerate(pairs):
            wbd = wbd.at[i * dim:(i + 1) * dim, p * dim:(p + 1) * dim].set(w[p].T)
        return wbd
    # Grouped layout: [a, p, b] = W_p^T[a, b]
    return jnp.transpose(w, (2, 0, 1)).reshape(dim, num_pairs * dim)


def _vmem_budget_bytes():
    """~75% of per-core VMEM: ~48 MiB on v7x (64 MiB), ~96 MiB on v5e/v6e (128 MiB)."""
    cap = 64 * 1024 * 1024  # conservative default = v7x per-TC capacity
    try:
        cap = int(pltpu.get_tpu_info().vmem_capacity_bytes)
    except Exception:
        pass
    return (cap * 3) // 4


def _pick_batch_tile(batch, bytes_per_row, fixed_bytes, vmem_budget):
    """Largest layout-legal divisor of `batch` that fits the VMEM budget.

    Prefers tiles that (a) are a multiple of 8 sublanes (or the full batch,
    which is always layout-legal) and (b) leave >= 2 grid steps so the
    "parallel" batch axis can feed both v7x TensorCores.
    """
    avail = max(vmem_budget - fixed_bytes, 0)
    max_rows = max(avail // max(bytes_per_row, 1), 1)
    divisors = [d for d in range(1, batch + 1) if batch % d == 0]

    def layout_ok(d):
        return d % 8 == 0 or d == batch

    for want_two_steps in (True, False):
        cands = [d for d in divisors
                 if layout_ok(d) and d <= max_rows
                 and (not want_two_steps or d <= batch // 2 or batch < 16)]
        if cands:
            return max(cands)
    return batch  # last resort: single full-batch block (always layout-legal)


def bilinear_interaction(x, wt_packed, num_fields, out_dtype=None):
    """
    x:         (batch, num_fields, D)
    wt_packed: output of pack_bilinear_weights(); its dtype sets the MXU operand
               dtype (f32 or bf16).  Accumulation is always f32.
    out_dtype: output dtype (default x.dtype; bf16 halves output HBM traffic if
               the consumer tolerates it).
    returns:   (batch, num_pairs, D)
    """
    batch, nf, dim = x.shape
    assert nf == num_fields and num_fields >= 2
    num_pairs = num_fields * (num_fields - 1) // 2
    fd, pd = num_fields * dim, num_pairs * dim
    out_dtype = jnp.dtype(out_dtype) if out_dtype is not None else x.dtype

    if wt_packed.shape == (fd, pd):
        kernel_fn, w_rows = _bilinear_blockdiag_kernel, fd
    elif wt_packed.shape == (dim, pd):
        kernel_fn, w_rows = _bilinear_grouped_kernel, dim
    else:
        raise ValueError(f"unexpected packed weight shape {wt_packed.shape}")

    mxu_dtype = wt_packed.dtype
    x_bytes = jnp.dtype(x.dtype).itemsize
    w_bytes = jnp.dtype(mxu_dtype).itemsize
    o_bytes = jnp.dtype(out_dtype).itemsize

    # VMEM accounting: double-buffered x / out blocks, resident packed weight
    # (counted twice in case the pipeliner double-buffers the constant block),
    # plus in-kernel f32 temporaries (y, xj, product) and dtype-cast views of x.
    fixed_bytes = 2 * wt_packed.size * w_bytes + (2 << 20)   # + ~2 MiB headroom
    per_row_bytes = (2 * fd * x_bytes                        # x block x2 buffers
                     + 2 * pd * o_bytes                      # out block x2 buffers
                     + 3 * pd * 4                            # y, xj, y*xj (f32)
                     + fd * 4 + fd * w_bytes)                # xf32, x_mxu casts
    budget = _vmem_budget_bytes()

    b_tile = _pick_batch_tile(batch, per_row_bytes, fixed_bytes, budget)
    grid = (batch // b_tile,)

    # Contiguous, free reshape: (B, F, D) -> (B, F*D).  No gather, no transpose.
    x2d = x.reshape(batch, fd)

    kernel = functools.partial(kernel_fn, num_fields=num_fields, dim=dim,
                               mxu_dtype=mxu_dtype)

    out2d = pl.pallas_call(
        kernel,
        out_shape=jax.ShapeDtypeStruct((batch, pd), out_dtype),
        grid_spec=pltpu.PrefetchScalarGridSpec(
            num_scalar_prefetch=0,
            grid=grid,
            in_specs=[
                # x: one lane-dense (B_tile, F*D) block per grid step.
                pl.BlockSpec((b_tile, fd), lambda b: (b, 0)),
                # packed weights: constant index_map -> DMA'd once, resident.
                # NOTE(perf): pipeline_mode=pl.Buffered(1) would avoid
                # double-buffering this constant block; negligible at these
                # sizes, omitted for maximal compile compatibility.
                pl.BlockSpec((w_rows, pd), lambda b: (0, 0)),
            ],
            out_specs=pl.BlockSpec((b_tile, pd), lambda b: (b, 0)),
        ),
        compiler_params=pltpu.CompilerParams(
            dimension_semantics=("parallel",),   # batch tiles -> both TCs on v7x
            vmem_limit_bytes=int(budget),
        ),
    )(x2d, wt_packed)

    # Contiguous, free reshape back to the PyTorch output layout (B, P, D).
    return out2d.reshape(batch, num_pairs, dim)


def reference_bilinear(x, weights):
    """Pure-JAX reference matching the PyTorch module ('field_interaction')."""
    batch, num_fields, dim = x.shape
    outs = []
    for p, (i, j) in enumerate(combinations(range(num_fields), 2)):
        y = x[:, i, :] @ weights[p].T            # nn.Linear(bias=False)
        outs.append((y * x[:, j, :])[:, None, :])
    return jnp.concatenate(outs, axis=1)         # (B, P, D)


if __name__ == "__main__":
    batch = 2
    num_fields = 4
    input_dim = 32
    num_pairs = num_fields * (num_fields - 1) // 2

    key = jax.random.PRNGKey(0)
    kx, kw = jax.random.split(key)
    x = jax.random.normal(kx, (batch, num_fields, input_dim), dtype=jnp.float32)
    # Deterministic stand-in for nn.Linear's default init (uniform over +-1/sqrt(D)).
    bound = 1.0 / jnp.sqrt(jnp.float32(input_dim))
    weights = jax.random.uniform(
        kw, (num_pairs, input_dim, input_dim),
        minval=-bound, maxval=bound, dtype=jnp.float32)

    ref = reference_bilinear(x, weights)

    # 1) f32 MXU operands: exact semantics match against the reference.
    wt_f32 = pack_bilinear_weights(weights, num_fields)
    out = jax.block_until_ready(bilinear_interaction(x, wt_f32, num_fields))
    assert out.shape == (batch, num_pairs, input_dim)
    assert jnp.allclose(out, ref, atol=1e-5, rtol=1e-5)

    # 2) bf16 MXU operands (recommended on v6e/v7x): f32 accumulation and f32
    #    x_j multiply; tolerance loosened only for bf16 operand rounding.
    wt_bf16 = pack_bilinear_weights(weights, num_fields, mxu_dtype=jnp.bfloat16)
    out_bf16 = jax.block_until_ready(bilinear_interaction(x, wt_bf16, num_fields))
    assert out_bf16.shape == (batch, num_pairs, input_dim)
    assert jnp.allclose(out_bf16, ref, atol=1.5e-1, rtol=5e-2)

    print("KERNEL_OK")
</pallas_src>

<mosaic_0001>
module attributes {stable_mosaic.version = 11 : i64} {
  func.func @_bilinear_blockdiag_kernel(%arg0: i32, %arg1: memref<2x128xf32, #tpu.memory_space<vmem>>, %arg2: memref<128x192xf32, #tpu.memory_space<vmem>>, %arg3: memref<2x192xf32, #tpu.memory_space<vmem>>) attributes {dimension_semantics = [#tpu.dimension_semantics<parallel>], iteration_bounds = array<i64: 1>, scalar_prefetch = 0 : i64, scratch_operands = 0 : i64, tpu.core_type = #tpu.core_type<tc>, window_params = [{transform_indices = @transform_0, window_bounds = array<i64: 2, 128>}, {pipeline_mode = #tpu.pipeline_mode<synchronous>, transform_indices = @transform_1, window_bounds = array<i64: 128, 192>}, {transform_indices = @transform_2, window_bounds = array<i64: 2, 192>}]} {
    %c0 = arith.constant 0 : index
    %c0_0 = arith.constant 0 : index
    %0 = vector.load %arg1[%c0, %c0_0] : memref<2x128xf32, #tpu.memory_space<vmem>>, vector<2x128xf32>
    %c0_1 = arith.constant 0 : index
    %c0_2 = arith.constant 0 : index
    %1 = vector.load %arg2[%c0_1, %c0_2] : memref<128x192xf32, #tpu.memory_space<vmem>>, vector<128x192xf32>
    %cst = arith.constant dense<0.000000e+00> : vector<2x192xf32>
    %2 = tpu.matmul %0, %1, %cst {dimension_numbers = #tpu.dot_dimension_numbers<[1], [0], [0], [1], [0, 0, 1, 1], [], []>} : vector<2x128xf32>, vector<128x192xf32>, vector<2x192xf32> -> vector<2x192xf32>
    %3 = vector.extract_strided_slice %0 {offsets = [0, 32], sizes = [2, 96], strides = [1, 1]} : vector<2x128xf32> to vector<2x96xf32>
    %4 = vector.extract_strided_slice %0 {offsets = [0, 64], sizes = [2, 64], strides = [1, 1]} : vector<2x128xf32> to vector<2x64xf32>
    %5 = vector.extract_strided_slice %0 {offsets = [0, 96], sizes = [2, 32], strides = [1, 1]} : vector<2x128xf32> to vector<2x32xf32>
    %6 = tpu.concatenate %3, %4, %5 in 1 : vector<2x96xf32>, vector<2x64xf32>, vector<2x32xf32> -> vector<2x192xf32>
    %7 = arith.mulf %2, %6 : vector<2x192xf32>
    %c0_3 = arith.constant 0 : index
    %c0_4 = arith.constant 0 : index
    %8 = vector.load %arg3[%c0_3, %c0_4] : memref<2x192xf32, #tpu.memory_space<vmem>>, vector<2x192xf32>
    tpu.vector_store %arg3[%c0_3, %c0_4], %7 {strides = array<i32>} : memref<2x192xf32, #tpu.memory_space<vmem>>, vector<2x192xf32>,
    return
  }
  func.func @transform_0(%arg0: i32) -> (i32, i32) {
    %c0_i32 = arith.constant 0 : i32
    %c0_i32_0 = arith.constant 0 : i32
    return %arg0, %c0_i32 : i32, i32
  }
  func.func @transform_1(%arg0: i32) -> (i32, i32) {
    %c0_i32 = arith.constant 0 : i32
    %c0_i32_0 = arith.constant 0 : i32
    %c0_i32_1 = arith.constant 0 : i32
    return %c0_i32, %c0_i32_0 : i32, i32
  }
  func.func @transform_2(%arg0: i32) -> (i32, i32) {
    %c0_i32 = arith.constant 0 : i32
    %c0_i32_0 = arith.constant 0 : i32
    return %arg0, %c0_i32 : i32, i32
  }
}

</mosaic_0001>

<bundles_post_ra>
// kernel: tpu_custom_call.1
= control target key start
LH: loop header
LB: loop body
LE: loop exit
PB: predicated region body
PF: predicated region fallthrough
CT: control target
= control target key end

     0   :  { %s156_s11 = smov 32   ;;  %s277_s0 = inlined_call_operand.vmem [shape: f32[2,128], index: 0, kind: input, shape index: {}]   ;;  %s278_s1 = inlined_call_operand.vmem [shape: f32[128,192], index: 1, kind: input, shape index: {}]   ;;  %s279_s2 = inlined_call_operand.hbm [shape: f32[2,192], index: 2, kind: output, shape index: {}]  }
   0x1   :  { %v43_v0 = vld [vmem:[%s278_s1 + $0xf0] sm:$0xff]  ;;  %v44_v1 = vld [vmem:[%s278_s1 + $0xf8] sm:$0xff]  ;;  %v41_v2 = vld [vmem:[%s278_s1 + $0xe0] sm:$0xff] }
   0x2   :  { %45 = vmatpush.msra.mxu0 %v43_v0  ;;  %65 = vmatpush.msra.mxu1 %v44_v1  ;;  %v42_v3 = vld [vmem:[%s278_s1 + $0xe8] sm:$0xff]  ;;  %v39_v4 = vld [vmem:[%s278_s1 + $0xd0] sm:$0xff]  ;;  %v40_v5 = vld [vmem:[%s278_s1 + $0xd8] sm:$0xff] }
   0x3   :  { %v37_v6 = vld [vmem:[%s278_s1 + $0xc0] sm:$0xff]  ;;  %v38_v7 = vld [vmem:[%s278_s1 + $0xc8] sm:$0xff]  ;;  %v35_v8 = vld [vmem:[%s278_s1 + $0xb0] sm:$0xff] }
   0x4   :  { %46 = vmatpush.msra.mxu0 %v41_v2  ;;  %66 = vmatpush.msra.mxu1 %v42_v3  ;;  %v36_v9 = vld [vmem:[%s278_s1 + $0xb8] sm:$0xff]  ;;  %v33_v10 = vld [vmem:[%s278_s1 + $0xa0] sm:$0xff]  ;;  %v34_v11 = vld [vmem:[%s278_s1 + $0xa8] sm:$0xff] }
   0x5   :  { %v12_v12 = vld [vmem:[%s277_s0] sm:$0x3]  ;;  %v31_v13 = vld [vmem:[%s278_s1 + $0x90] sm:$0xff]  ;;  %v32_v14 = vld [vmem:[%s278_s1 + $0x98] sm:$0xff] }
   0x6   :  { %47 = vmatpush.msra.mxu0 %v39_v4  ;;  %67 = vmatpush.msra.mxu1 %v40_v5 }
   0x7   :  { %89 = vrot.lane.b32.xlu0 %v12_v12, %s156_s11 }
   0x8   :  { %48 = vmatpush.msra.mxu0 %v37_v6  ;;  %68 = vmatpush.msra.mxu1 %v38_v7 }
   0xa   :  { %49 = vmatpush.msra.mxu0 %v35_v8  ;;  %69 = vmatpush.msra.mxu1 %v36_v9 }
   0xc   :  { %50 = vmatpush.msra.mxu0 %v33_v10  ;;  %70 = vmatpush.msra.mxu1 %v34_v11 }
   0xd   :  { %7 = vsyncpa [#allocation3], 0  ;;  %v29_v15 = vld [vmem:[%s278_s1 + $0x80] sm:$0xff]  ;;  %v30_v16 = vld [vmem:[%s278_s1 + $0x88] sm:$0xff]  ;;  %s157_s15 = smov 96   ;;  %s158_s28 = smov 64  }
   0xe   :  { %86 = vrot.lane.b32.xlu1 %v12_v12, %s157_s15  ;;  %51 = vmatpush.msra.mxu0 %v31_v13  ;;  %v27_v17 = vld [vmem:[%s278_s1 + $0x70] sm:$0xff]  ;;  %v28_v18 = vld [vmem:[%s278_s1 + $0x78] sm:$0xff]  ;;  %v25_v19 = vld [vmem:[%s278_s1 + $0x60] sm:$0xff]  ;;  %vm97_vm0 = vcmask 261120   ;;  %vm95_vm1 = vcmask 785408   ;;  %vm104_vm2 = vcmask 1041408  }
   0xf   :  { %71 = vmatpush.msra.mxu1 %v32_v14  ;;  %v26_v20 = vld [vmem:[%s278_s1 + $0x68] sm:$0xff]  ;;  %v23_v21 = vld [vmem:[%s278_s1 + $0x50] sm:$0xff]  ;;  %v24_v22 = vld [vmem:[%s278_s1 + $0x58] sm:$0xff]  ;;  %92 = vrot.lane.b32.xlu0 %v12_v12, %s158_s28  ;;  %vm107_vm3 = vcmask 519170   ;;  %s159_s20 = smov [#allocation2]   ;;  %s117_s23 = sshll.u32 %s279_s2, 4  ;;  %s118_s23 = int_to_ptr.hbm [resolvable:$true] %s117_s23 }
  0x10   :  { %52 = vmatpush.msra.mxu0 %v29_v15  ;;  %v21_v23 = vld [vmem:[%s278_s1 + $0x40] sm:$0xff]  ;;  %v22_v24 = vld [vmem:[%s278_s1 + $0x48] sm:$0xff]  ;;  %v19_v25 = vld [vmem:[%s278_s1 + $0x30] sm:$0xff]  ;;  %s115_s21 = sshll.u32 %s159_s20, 4  ;;  %s116_s21 = int_to_ptr.vmem [resolvable:$true] %s115_s21 }
  0x11   :  { %72 = vmatpush.msra.mxu1 %v30_v16  ;;  %v20_v26 = vld [vmem:[%s278_s1 + $0x38] sm:$0xff]  ;;  %v17_v27 = vld [vmem:[%s278_s1 + $0x20] sm:$0xff]  ;;  %v18_v28 = vld [vmem:[%s278_s1 + $0x28] sm:$0xff] }
  0x12   :  { %53 = vmatpush.msra.mxu0 %v27_v17  ;;  %v15_v29 = vld [vmem:[%s278_s1 + $0x10] sm:$0xff]  ;;  %v16_v30 = vld [vmem:[%s278_s1 + $0x18] sm:$0xff]  ;;  %v13_v31 = vld [vmem:[%s278_s1] sm:$0xff] }
  0x13   :  { %73 = vmatpush.msra.mxu1 %v28_v18  ;;  %v14_v32 = vld [vmem:[%s278_s1 + $0x8] sm:$0xff]  ;;  %vm108_vm4 = vmor %vm107_vm3, %vm104_vm2 }
  0x14   :  { %54 = vmatpush.msra.mxu0 %v25_v19 }
  0x15   :  { %74 = vmatpush.msra.mxu1 %v26_v20 }
  0x16   :  { %55 = vmatpush.msra.mxu0 %v23_v21 }
  0x17   :  { %75 = vmatpush.msra.mxu1 %v24_v22 }
  0x18   :  { %56 = vmatpush.msra.mxu0 %v21_v23 }
  0x19   :  { %76 = vmatpush.msra.mxu1 %v22_v24 }
  0x1a   :  { %57 = vmatpush.msra.mxu0 %v19_v25 }
  0x1b   :  { %77 = vmatpush.msra.mxu1 %v20_v26 }
  0x1c   :  { %58 = vmatpush.msra.mxu0 %v17_v27 }
  0x1d   :  { %78 = vmatpush.msra.mxu1 %v18_v28 }
  0x1e   :  { %59 = vmatpush.msra.mxu0 %v15_v29 }
  0x1f   :  { %79 = vmatpush.msra.mxu1 %v16_v30 }
  0x20   :  { %60 = vmatpush.msra.mxu0 %v13_v31 }
  0x21   :  { %80 = vmatpush.msra.mxu1 %v14_v32  ;;  %61 = vmatmul.f32.vlgmr.msra.gmra.mxu0 %v12_v12 }
  0x22   :  { %81 = vmatmul.f32.vlgmr.msra.gmra.mxu1 %v12_v12 }
  0x79   :  { %v90_v33 = vpop.permute.xlu0 %89 }
  0x80   :  { %v87_v35 = vpop.permute.xlu1 %86 }
  0x81   :  { %v93_v34 = vpop.permute.xlu0 %92  ;;  %v96_v40 = vsel %vm95_vm1, %v87_v35, %v90_v33 }
  0x82   :  { %v98_v38 = vsel %vm97_vm0, %v90_v33, %v93_v34 }
  0x9e   :  { %v62_v36 = vpop.f32.mrf.mxu0 }
  0x9f   :  { %v82_v37 = vpop.f32.mrf.mxu1  ;;  %v99_v41 = vmul.f32 %v96_v40, %v62_v36 }
  0xa0   :  { %v100_v39 = vmul.f32 %v98_v38, %v82_v37 }
  0xa2   :  { %v103_v42 = vrot.slane %v100_v39, 6 }
  0xa4   :  { %v105_v43 = vsel %vm104_vm2, %v99_v41, %v103_v42 }
  0xa5   :  { %109 = vst.msk [vmem:[#allocation2] sm:$0xf] %vm108_vm4, %v105_v43 }
  0xa6   :  { %120 = dma.vmem_to_hbm [thread:$0]  %s116_s21, 64, %s118_s23, [#allocation3]  }
  0xa7   :  { %154 = dma.done.wait [#allocation3], 64  }
  0xa8   :  { %155 = vsyncadd [#allocation3], 4294967232 }
  0xa9   :  { %125 = vsyncpa [#allocation3], 1 }

</bundles_post_ra>
